<compile_context>
chip_gen: v5e
topology: v5e:2x2
jax: 0.10.0
libtpu: 0.0.40
codegen_flags: <defaults>
</compile_context>

<pallas_src>
import functools

import jax
import jax.numpy as jnp
from jax.experimental import pallas as pl
from jax.experimental.pallas import tpu as pltpu


def _mha_flash_kernel(
    xq_ref, xkv_ref,
    wq_ref, bq_ref, wkv_ref, bkv_ref, wproj_ref, bproj_ref,
    out_ref,
    q_scratch, m_scratch, l_scratch, acc_scratch,
    *, num_heads, head_dim, scale, q_tile, kv_tile, compute_dtype, causal,
):
    H, D = num_heads, head_dim
    HD = H * D
    qi = pl.program_id(1)
    ki = pl.program_id(2)
    q_start = qi * q_tile
    kv_start = ki * kv_tile

    # ---------------- init (first KV step for this (b, q-tile)) ----------------
    @pl.when(ki == 0)
    def _init():
        xq = xq_ref[0].astype(compute_dtype)                       # (tq, E)
        q2d = jnp.dot(xq, wq_ref[...],
                      preferred_element_type=jnp.float32) + bq_ref[...]
        q2d = q2d * scale                                          # fold scale into q once
        q3 = jnp.transpose(q2d.reshape(q_tile, H, D), (1, 0, 2))   # (H, tq, D)
        q_scratch[...] = q3.astype(q_scratch.dtype)
        m_scratch[...] = jnp.full_like(m_scratch, -1e30)
        l_scratch[...] = jnp.zeros_like(l_scratch)
        acc_scratch[...] = jnp.zeros_like(acc_scratch)

    # ---------------- online-softmax update over this KV block -----------------
    def _update_body():
        xkv = xkv_ref[0].astype(compute_dtype)                     # (tkv, E)
        kv2d = jnp.dot(xkv, wkv_ref[...],
                       preferred_element_type=jnp.float32) + bkv_ref[...]
        k3 = jnp.transpose(kv2d[:, :HD].reshape(kv_tile, H, D), (1, 0, 2))
        v3 = jnp.transpose(kv2d[:, HD:].reshape(kv_tile, H, D), (1, 0, 2))
        k3 = k3.astype(compute_dtype)
        v3 = v3.astype(compute_dtype)
        q3 = q_scratch[...].astype(compute_dtype)                  # (H, tq, D)

        s = jnp.einsum('hqd,hkd->hqk', q3, k3,
                       preferred_element_type=jnp.float32)         # (H, tq, tkv) f32
        if causal:
            rows = q_start + jax.lax.broadcasted_iota(
                jnp.int32, (1, q_tile, kv_tile), 1)
            cols = kv_start + jax.lax.broadcasted_iota(
                jnp.int32, (1, q_tile, kv_tile), 2)
            s = s + jnp.where(cols <= rows, 0.0, -1e30)

        m_prev = m_scratch[...]
        m_new = jnp.maximum(m_prev, s.max(axis=-1, keepdims=True))
        alpha = jnp.exp(m_prev - m_new)
        p = jnp.exp(s - m_new)
        l_scratch[...] = alpha * l_scratch[...] + p.sum(axis=-1, keepdims=True)
        acc_scratch[...] = alpha * acc_scratch[...] + jnp.einsum(
            'hqk,hkd->hqd', p.astype(compute_dtype), v3,
            preferred_element_type=jnp.float32)
        m_scratch[...] = m_new

    if causal:
        # Skip KV blocks that are entirely above the causal diagonal.
        @pl.when(kv_start < q_start + q_tile)
        def _update():
            _update_body()
    else:
        _update_body()

    # ---------------- finalize on the last KV step ------------------------------
    @pl.when(ki == pl.num_programs(2) - 1)
    def _finalize():
        inv_l = pl.reciprocal(l_scratch[...], approx=True)         # EUP slot
        o = acc_scratch[...] * inv_l                               # (H, tq, D) f32
        # "concat heads" is just a layout change, fused into the projection matmul
        o2d = jnp.transpose(o, (1, 0, 2)).reshape(q_tile, HD)      # (tq, H*D)
        out2d = jnp.dot(o2d.astype(compute_dtype), wproj_ref[...],
                        preferred_element_type=jnp.float32) + bproj_ref[...]
        out_ref[0] = out2d.astype(out_ref.dtype)                   # lane-dense (tq, E)


def multi_head_attention(x, params, *, num_heads, head_dim,
                         q_tile=128, kv_tile=128,
                         use_bf16_matmul=False, causal=True):
    B, T, E = x.shape
    HD = num_heads * head_dim
    assert params["wq"].shape == (E, HD) and params["wproj"].shape == (HD, E)

    q_tile = min(q_tile, T)
    kv_tile = min(kv_tile, T)
    assert T % q_tile == 0 and T % kv_tile == 0, "T must divide the tile sizes"
    num_q = T // q_tile
    num_kv = T // kv_tile

    compute_dtype = jnp.bfloat16 if use_bf16_matmul else jnp.float32

    # Host-side weight prep: fuse K|V projections, keep biases f32 & lane-dense (1, N).
    wq = params["wq"].astype(compute_dtype)                                   # (E, HD)
    wkv = jnp.concatenate([params["wk"], params["wv"]],
                          axis=1).astype(compute_dtype)                       # (E, 2HD)
    wproj = params["wproj"].astype(compute_dtype)                             # (HD, E)
    bq = params["bq"].reshape(1, HD).astype(jnp.float32)
    bkv = jnp.concatenate([params["bk"], params["bv"]]
                          ).reshape(1, 2 * HD).astype(jnp.float32)
    bproj = params["bproj"].reshape(1, E).astype(jnp.float32)

    scale = float(E) ** -0.5   # PyTorch scales by data_dim (= embedding dim), not head_dim

    kernel = functools.partial(
        _mha_flash_kernel,
        num_heads=num_heads, head_dim=head_dim, scale=scale,
        q_tile=q_tile, kv_tile=kv_tile,
        compute_dtype=compute_dtype, causal=causal)

    def const2d(shape):
        return pl.BlockSpec(shape, lambda b, qi, ki: (0, 0))

    grid_spec = pltpu.PrefetchScalarGridSpec(
        num_scalar_prefetch=0,
        grid=(B, num_q, num_kv),
        in_specs=[
            pl.BlockSpec((1, q_tile, E), lambda b, qi, ki: (b, qi, 0)),   # x (query rows)
            pl.BlockSpec((1, kv_tile, E), lambda b, qi, ki: (b, ki, 0)),  # x (kv rows)
            const2d((E, HD)),          # wq
            const2d((1, HD)),          # bq
            const2d((E, 2 * HD)),      # wkv (fused K|V)
            const2d((1, 2 * HD)),      # bkv
            const2d((HD, E)),          # wproj
            const2d((1, E)),           # bproj
        ],
        out_specs=pl.BlockSpec((1, q_tile, E), lambda b, qi, ki: (b, qi, 0)),
        scratch_shapes=[
            pltpu.VMEM((num_heads, q_tile, head_dim), compute_dtype),  # q (per q-tile)
            pltpu.VMEM((num_heads, q_tile, 1), jnp.float32),           # m (running max)
            pltpu.VMEM((num_heads, q_tile, 1), jnp.float32),           # l (running denom)
            pltpu.VMEM((num_heads, q_tile, head_dim), jnp.float32),    # acc
        ],
    )

    return pl.pallas_call(
        kernel,
        out_shape=jax.ShapeDtypeStruct((B, T, E), x.dtype),
        grid_spec=grid_spec,
        compiler_params=pltpu.CompilerParams(
            # batch and q-tile axes are independent work (v7x: 2 TCs); kv axis carries
            # the online-softmax accumulator.
            dimension_semantics=("parallel", "parallel", "arbitrary"),
            # Explicit budget: above v5e's 16 MiB default, below v7x's 64 MiB physical.
            vmem_limit_bytes=48 * 1024 * 1024,
        ),
    )(x, x, wq, bq, wkv, bkv, wproj, bproj)


# ---------------- pure-JAX reference (matches the PyTorch module) ----------------
def reference_mha(x, params, *, num_heads, head_dim):
    B, T, E = x.shape
    q = x @ params["wq"] + params["bq"]
    k = x @ params["wk"] + params["bk"]
    v = x @ params["wv"] + params["bv"]
    mask = jnp.tril(jnp.ones((T, T), bool))
    outs = []
    for h in range(num_heads):
        sl = slice(h * head_dim, (h + 1) * head_dim)
        s = q[..., sl] @ jnp.swapaxes(k[..., sl], -2, -1) * E ** (-0.5)
        s = jnp.where(mask, s, -jnp.inf)
        w = jax.nn.softmax(s, axis=-1)
        outs.append(w @ v[..., sl])
    att = jnp.concatenate(outs, axis=-1)
    return att @ params["wproj"] + params["bproj"]


if __name__ == "__main__":
    B, T, E, H = 2, 8, 32, 4
    D = E // H   # head_dim = 8, context_size = T

    key = jax.random.PRNGKey(0)
    ks = jax.random.split(key, 9)

    def init(k, shape, scale=0.1):
        return (scale * jax.random.normal(k, shape)).astype(jnp.float32)

    # Per-head Linear weights concatenated along the output dim (same math as
    # torch.cat([h(x) for h in heads], -1) with separate nn.Linear per head).
    params = {
        "wq": init(ks[0], (E, H * D)), "bq": init(ks[1], (H * D,)),
        "wk": init(ks[2], (E, H * D)), "bk": init(ks[3], (H * D,)),
        "wv": init(ks[4], (E, H * D)), "bv": init(ks[5], (H * D,)),
        "wproj": init(ks[6], (H * D, E)), "bproj": init(ks[7], (E,)),
    }
    x = jax.random.normal(ks[8], (B, T, E), jnp.float32)

    ref = reference_mha(x, params, num_heads=H, head_dim=D)

    # f32 MXU-operand path (exact up to the approx reciprocal).
    out = multi_head_attention(x, params, num_heads=H, head_dim=D,
                               use_bf16_matmul=False)
    out = jax.block_until_ready(out)
    assert out.shape == (B, T, E)
    assert jnp.allclose(out, ref, atol=2e-3, rtol=2e-3), "f32 path mismatch vs reference"

    # bf16 MXU-operand path (f32 accumulation) — the fast path on v6e/v7x.
    out_bf16 = multi_head_attention(x, params, num_heads=H, head_dim=D,
                                    use_bf16_matmul=True)
    out_bf16 = jax.block_until_ready(out_bf16)
    assert jnp.allclose(out_bf16, ref, atol=3e-2, rtol=3e-2), "bf16 path mismatch vs reference"

    print("KERNEL_OK")
</pallas_src>

<mosaic_0001>
module attributes {stable_mosaic.version = 11 : i64} {
  func.func @_mha_flash_kernel(%arg0: i32, %arg1: i32, %arg2: i32, %arg3: memref<1x8x32xf32, #tpu.memory_space<vmem>>, %arg4: memref<1x8x32xf32, #tpu.memory_space<vmem>>, %arg5: memref<32x32xf32, #tpu.memory_space<vmem>>, %arg6: memref<1x32xf32, #tpu.memory_space<vmem>>, %arg7: memref<32x64xf32, #tpu.memory_space<vmem>>, %arg8: memref<1x64xf32, #tpu.memory_space<vmem>>, %arg9: memref<32x32xf32, #tpu.memory_space<vmem>>, %arg10: memref<1x32xf32, #tpu.memory_space<vmem>>, %arg11: memref<1x8x32xf32, #tpu.memory_space<vmem>>, %arg12: memref<4x8x8xf32, #tpu.memory_space<vmem>>, %arg13: memref<4x8x1xf32, #tpu.memory_space<vmem>>, %arg14: memref<4x8x1xf32, #tpu.memory_space<vmem>>, %arg15: memref<4x8x8xf32, #tpu.memory_space<vmem>>) attributes {dimension_semantics = [#tpu.dimension_semantics<parallel>, #tpu.dimension_semantics<parallel>, #tpu.dimension_semantics<arbitrary>], iteration_bounds = array<i64: 2, 1, 1>, scalar_prefetch = 0 : i64, scratch_operands = 4 : i64, tpu.core_type = #tpu.core_type<tc>, window_params = [{transform_indices = @transform_0, window_bounds = array<i64: 1, 8, 32>}, {transform_indices = @transform_1, window_bounds = array<i64: 1, 8, 32>}, {pipeline_mode = #tpu.pipeline_mode<synchronous>, transform_indices = @transform_2, window_bounds = array<i64: 32, 32>}, {pipeline_mode = #tpu.pipeline_mode<synchronous>, transform_indices = @transform_3, window_bounds = array<i64: 1, 32>}, {pipeline_mode = #tpu.pipeline_mode<synchronous>, transform_indices = @transform_4, window_bounds = array<i64: 32, 64>}, {pipeline_mode = #tpu.pipeline_mode<synchronous>, transform_indices = @transform_5, window_bounds = array<i64: 1, 64>}, {pipeline_mode = #tpu.pipeline_mode<synchronous>, transform_indices = @transform_6, window_bounds = array<i64: 32, 32>}, {pipeline_mode = #tpu.pipeline_mode<synchronous>, transform_indices = @transform_7, window_bounds = array<i64: 1, 32>}, {transform_indices = @transform_8, window_bounds = array<i64: 1, 8, 32>}]} {
    %c8_i32 = arith.constant 8 : i32
    %0 = arith.muli %arg1, %c8_i32 : i32
    %c8_i32_0 = arith.constant 8 : i32
    %1 = arith.muli %arg2, %c8_i32_0 : i32
    %c0_i32 = arith.constant 0 : i32
    %2 = arith.cmpi eq, %arg2, %c0_i32 : i32
    %3 = arith.extui %2 : i1 to i32
    %c0_i32_1 = arith.constant 0 : i32
    %4 = arith.cmpi ne, %3, %c0_i32_1 : i32
    scf.if %4 {
      %c0 = arith.constant 0 : index
      %c0_6 = arith.constant 0 : index
      %c0_7 = arith.constant 0 : index
      %12 = vector.load %arg3[%c0, %c0_6, %c0_7] : memref<1x8x32xf32, #tpu.memory_space<vmem>>, vector<1x8x32xf32>
      %13 = vector.shape_cast %12 : vector<1x8x32xf32> to vector<8x32xf32>
      %c0_8 = arith.constant 0 : index
      %c0_9 = arith.constant 0 : index
      %14 = vector.load %arg5[%c0_8, %c0_9] : memref<32x32xf32, #tpu.memory_space<vmem>>, vector<32x32xf32>
      %cst = arith.constant dense<0.000000e+00> : vector<8x32xf32>
      %15 = tpu.matmul %13, %14, %cst {dimension_numbers = #tpu.dot_dimension_numbers<[1], [0], [0], [1], [0, 0, 1, 1], [], []>} : vector<8x32xf32>, vector<32x32xf32>, vector<8x32xf32> -> vector<8x32xf32>
      %c0_10 = arith.constant 0 : index
      %c0_11 = arith.constant 0 : index
      %16 = vector.load %arg6[%c0_10, %c0_11] : memref<1x32xf32, #tpu.memory_space<vmem>>, vector<1x32xf32>
      %17 = vector.broadcast %16 : vector<1x32xf32> to vector<8x32xf32>
      %18 = arith.addf %15, %17 : vector<8x32xf32>
      %cst_12 = arith.constant 0.176776692 : f32
      %19 = vector.broadcast %cst_12 : f32 to vector<8x32xf32>
      %20 = arith.mulf %18, %19 : vector<8x32xf32>
      %21 = vector.shape_cast %20 : vector<8x32xf32> to vector<8x4x8xf32>
      %22 = tpu.transpose %21, [1, 0, 2] : vector<8x4x8xf32> -> vector<4x8x8xf32>
      %c0_13 = arith.constant 0 : index
      %c0_14 = arith.constant 0 : index
      %c0_15 = arith.constant 0 : index
      %23 = vector.load %arg12[%c0_13, %c0_14, %c0_15] : memref<4x8x8xf32, #tpu.memory_space<vmem>>, vector<4x8x8xf32>
      tpu.vector_store %arg12[%c0_13, %c0_14, %c0_15], %22 {strides = array<i32>} : memref<4x8x8xf32, #tpu.memory_space<vmem>>, vector<4x8x8xf32>,
      %cst_16 = arith.constant -1.000000e+30 : f32
      %24 = vector.broadcast %cst_16 : f32 to vector<4x8x1xf32>
      %c0_17 = arith.constant 0 : index
      %c0_18 = arith.constant 0 : index
      %c0_19 = arith.constant 0 : index
      %25 = vector.load %arg13[%c0_17, %c0_18, %c0_19] : memref<4x8x1xf32, #tpu.memory_space<vmem>>, vector<4x8x1xf32>
      tpu.vector_store %arg13[%c0_17, %c0_18, %c0_19], %24 {strides = array<i32>} : memref<4x8x1xf32, #tpu.memory_space<vmem>>, vector<4x8x1xf32>,
      %cst_20 = arith.constant 0.000000e+00 : f32
      %26 = vector.broadcast %cst_20 : f32 to vector<4x8x1xf32>
      %c0_21 = arith.constant 0 : index
      %c0_22 = arith.constant 0 : index
      %c0_23 = arith.constant 0 : index
      %27 = vector.load %arg14[%c0_21, %c0_22, %c0_23] : memref<4x8x1xf32, #tpu.memory_space<vmem>>, vector<4x8x1xf32>
      tpu.vector_store %arg14[%c0_21, %c0_22, %c0_23], %26 {strides = array<i32>} : memref<4x8x1xf32, #tpu.memory_space<vmem>>, vector<4x8x1xf32>,
      %cst_24 = arith.constant 0.000000e+00 : f32
      %28 = vector.broadcast %cst_24 : f32 to vector<4x8x8xf32>
      %c0_25 = arith.constant 0 : index
      %c0_26 = arith.constant 0 : index
      %c0_27 = arith.constant 0 : index
      %29 = vector.load %arg15[%c0_25, %c0_26, %c0_27] : memref<4x8x8xf32, #tpu.memory_space<vmem>>, vector<4x8x8xf32>
      tpu.vector_store %arg15[%c0_25, %c0_26, %c0_27], %28 {strides = array<i32>} : memref<4x8x8xf32, #tpu.memory_space<vmem>>, vector<4x8x8xf32>,
    } else {
    }
    %c8_i32_2 = arith.constant 8 : i32
    %5 = arith.addi %0, %c8_i32_2 : i32
    %6 = arith.cmpi slt, %1, %5 : i32
    %7 = arith.extui %6 : i1 to i32
    %c0_i32_3 = arith.constant 0 : i32
    %8 = arith.cmpi ne, %7, %c0_i32_3 : i32
    scf.if %8 {
      %c0 = arith.constant 0 : index
      %c0_6 = arith.constant 0 : index
      %c0_7 = arith.constant 0 : index
      %12 = vector.load %arg4[%c0, %c0_6, %c0_7] : memref<1x8x32xf32, #tpu.memory_space<vmem>>, vector<1x8x32xf32>
      %13 = vector.shape_cast %12 : vector<1x8x32xf32> to vector<8x32xf32>
      %c0_8 = arith.constant 0 : index
      %c0_9 = arith.constant 0 : index
      %14 = vector.load %arg7[%c0_8, %c0_9] : memref<32x64xf32, #tpu.memory_space<vmem>>, vector<32x64xf32>
      %cst = arith.constant dense<0.000000e+00> : vector<8x64xf32>
      %15 = tpu.matmul %13, %14, %cst {dimension_numbers = #tpu.dot_dimension_numbers<[1], [0], [0], [1], [0, 0, 1, 1], [], []>} : vector<8x32xf32>, vector<32x64xf32>, vector<8x64xf32> -> vector<8x64xf32>
      %c0_10 = arith.constant 0 : index
      %c0_11 = arith.constant 0 : index
      %16 = vector.load %arg8[%c0_10, %c0_11] : memref<1x64xf32, #tpu.memory_space<vmem>>, vector<1x64xf32>
      %17 = vector.broadcast %16 : vector<1x64xf32> to vector<8x64xf32>
      %18 = arith.addf %15, %17 : vector<8x64xf32>
      %19 = vector.extract_strided_slice %18 {offsets = [0, 0], sizes = [8, 32], strides = [1, 1]} : vector<8x64xf32> to vector<8x32xf32>
      %20 = vector.shape_cast %19 : vector<8x32xf32> to vector<8x4x8xf32>
      %21 = tpu.transpose %20, [1, 0, 2] : vector<8x4x8xf32> -> vector<4x8x8xf32>
      %22 = vector.extract_strided_slice %18 {offsets = [0, 32], sizes = [8, 32], strides = [1, 1]} : vector<8x64xf32> to vector<8x32xf32>
      %23 = vector.shape_cast %22 : vector<8x32xf32> to vector<8x4x8xf32>
      %24 = tpu.transpose %23, [1, 0, 2] : vector<8x4x8xf32> -> vector<4x8x8xf32>
      %c0_12 = arith.constant 0 : index
      %c0_13 = arith.constant 0 : index
      %c0_14 = arith.constant 0 : index
      %25 = vector.load %arg12[%c0_12, %c0_13, %c0_14] : memref<4x8x8xf32, #tpu.memory_space<vmem>>, vector<4x8x8xf32>
      "tpu.trace_start"() <{level = 10 : i32, message = "hqd,hkd->hqk"}> : () -> ()
      %cst_15 = arith.constant dense<0.000000e+00> : vector<4x8x8xf32>
      %26 = tpu.matmul %25, %21, %cst_15 {dimension_numbers = #tpu.dot_dimension_numbers<[2], [2], [1], [1], [0, 0, 0, 1, 1, 1], [0], [0]>} : vector<4x8x8xf32>, vector<4x8x8xf32>, vector<4x8x8xf32> -> vector<4x8x8xf32>
      "tpu.trace_stop"() : () -> ()
      %27 = tpu.iota {dimensions = array<i32: 1>} : vector<1x8x8xi32>
      %28 = vector.broadcast %0 : i32 to vector<1x8x8xi32>
      %29 = arith.addi %28, %27 : vector<1x8x8xi32>
      %30 = tpu.iota {dimensions = array<i32: 2>} : vector<1x8x8xi32>
      %31 = vector.broadcast %1 : i32 to vector<1x8x8xi32>
      %32 = arith.addi %31, %30 : vector<1x8x8xi32>
      %33 = arith.cmpi sle, %32, %29 : vector<1x8x8xi32>
      %cst_16 = arith.constant 0.000000e+00 : f32
      %cst_17 = arith.constant -1.000000e+30 : f32
      %34 = vector.broadcast %cst_16 : f32 to vector<1x8x8xf32>
      %35 = vector.broadcast %cst_17 : f32 to vector<1x8x8xf32>
      %36 = arith.select %33, %34, %35 : vector<1x8x8xi1>, vector<1x8x8xf32>
      %37 = vector.broadcast %36 : vector<1x8x8xf32> to vector<4x8x8xf32>
      %38 = arith.addf %26, %37 : vector<4x8x8xf32>
      %c0_18 = arith.constant 0 : index
      %c0_19 = arith.constant 0 : index
      %c0_20 = arith.constant 0 : index
      %39 = vector.load %arg13[%c0_18, %c0_19, %c0_20] : memref<4x8x1xf32, #tpu.memory_space<vmem>>, vector<4x8x1xf32>
      %cst_21 = arith.constant dense<0xFF800000> : vector<4x8xf32>
      %40 = vector.multi_reduction <maximumf>, %38, %cst_21 [2] : vector<4x8x8xf32> to vector<4x8xf32>
      %41 = vector.shape_cast %40 : vector<4x8xf32> to vector<4x8x1xf32>
      %42 = arith.maximumf %39, %41 : vector<4x8x1xf32>
      %43 = arith.subf %39, %42 : vector<4x8x1xf32>
      %44 = math.exp %43 : vector<4x8x1xf32>
      %45 = vector.broadcast %42 : vector<4x8x1xf32> to vector<4x8x8xf32>
      %46 = arith.subf %38, %45 : vector<4x8x8xf32>
      %47 = math.exp %46 : vector<4x8x8xf32>
      %c0_22 = arith.constant 0 : index
      %c0_23 = arith.constant 0 : index
      %c0_24 = arith.constant 0 : index
      %48 = vector.load %arg14[%c0_22, %c0_23, %c0_24] : memref<4x8x1xf32, #tpu.memory_space<vmem>>, vector<4x8x1xf32>
      %49 = arith.mulf %44, %48 : vector<4x8x1xf32>
      %cst_25 = arith.constant dense<0.000000e+00> : vector<4x8xf32>
      %50 = vector.multi_reduction <add>, %47, %cst_25 [2] : vector<4x8x8xf32> to vector<4x8xf32>
      %51 = vector.shape_cast %50 : vector<4x8xf32> to vector<4x8x1xf32>
      %52 = arith.addf %49, %51 : vector<4x8x1xf32>
      %c0_26 = arith.constant 0 : index
      %c0_27 = arith.constant 0 : index
      %c0_28 = arith.constant 0 : index
      %53 = vector.load %arg14[%c0_26, %c0_27, %c0_28] : memref<4x8x1xf32, #tpu.memory_space<vmem>>, vector<4x8x1xf32>
      tpu.vector_store %arg14[%c0_26, %c0_27, %c0_28], %52 {strides = array<i32>} : memref<4x8x1xf32, #tpu.memory_space<vmem>>, vector<4x8x1xf32>,
      %c0_29 = arith.constant 0 : index
      %c0_30 = arith.constant 0 : index
      %c0_31 = arith.constant 0 : index
      %54 = vector.load %arg15[%c0_29, %c0_30, %c0_31] : memref<4x8x8xf32, #tpu.memory_space<vmem>>, vector<4x8x8xf32>
      %55 = vector.broadcast %44 : vector<4x8x1xf32> to vector<4x8x8xf32>
      %56 = arith.mulf %55, %54 : vector<4x8x8xf32>
      "tpu.trace_start"() <{level = 10 : i32, message = "hqk,hkd->hqd"}> : () -> ()
      %cst_32 = arith.constant dense<0.000000e+00> : vector<4x8x8xf32>
      %57 = tpu.matmul %47, %24, %cst_32 {dimension_numbers = #tpu.dot_dimension_numbers<[2], [1], [1], [2], [0, 0, 0, 1, 1, 2], [0], [0]>} : vector<4x8x8xf32>, vector<4x8x8xf32>, vector<4x8x8xf32> -> vector<4x8x8xf32>
      "tpu.trace_stop"() : () -> ()
      %58 = arith.addf %56, %57 : vector<4x8x8xf32>
      %c0_33 = arith.constant 0 : index
      %c0_34 = arith.constant 0 : index
      %c0_35 = arith.constant 0 : index
      %59 = vector.load %arg15[%c0_33, %c0_34, %c0_35] : memref<4x8x8xf32, #tpu.memory_space<vmem>>, vector<4x8x8xf32>
      tpu.vector_store %arg15[%c0_33, %c0_34, %c0_35], %58 {strides = array<i32>} : memref<4x8x8xf32, #tpu.memory_space<vmem>>, vector<4x8x8xf32>,
      %c0_36 = arith.constant 0 : index
      %c0_37 = arith.constant 0 : index
      %c0_38 = arith.constant 0 : index
      %60 = vector.load %arg13[%c0_36, %c0_37, %c0_38] : memref<4x8x1xf32, #tpu.memory_space<vmem>>, vector<4x8x1xf32>
      tpu.vector_store %arg13[%c0_36, %c0_37, %c0_38], %42 {strides = array<i32>} : memref<4x8x1xf32, #tpu.memory_space<vmem>>, vector<4x8x1xf32>,
    } else {
    }
    %c0_i32_4 = arith.constant 0 : i32
    %9 = arith.cmpi eq, %arg2, %c0_i32_4 : i32
    %10 = arith.extui %9 : i1 to i32
    %c0_i32_5 = arith.constant 0 : i32
    %11 = arith.cmpi ne, %10, %c0_i32_5 : i32
    scf.if %11 {
      %c0 = arith.constant 0 : index
      %c0_6 = arith.constant 0 : index
      %c0_7 = arith.constant 0 : index
      %12 = vector.load %arg14[%c0, %c0_6, %c0_7] : memref<4x8x1xf32, #tpu.memory_space<vmem>>, vector<4x8x1xf32>
      %13 = tpu.reciprocal %12 {approx = true} : vector<4x8x1xf32> -> vector<4x8x1xf32>
      %c0_8 = arith.constant 0 : index
      %c0_9 = arith.constant 0 : index
      %c0_10 = arith.constant 0 : index
      %14 = vector.load %arg15[%c0_8, %c0_9, %c0_10] : memref<4x8x8xf32, #tpu.memory_space<vmem>>, vector<4x8x8xf32>
      %15 = vector.broadcast %13 : vector<4x8x1xf32> to vector<4x8x8xf32>
      %16 = arith.mulf %14, %15 : vector<4x8x8xf32>
      %17 = tpu.transpose %16, [1, 0, 2] : vector<4x8x8xf32> -> vector<8x4x8xf32>
      %18 = vector.shape_cast %17 : vector<8x4x8xf32> to vector<8x32xf32>
      %c0_11 = arith.constant 0 : index
      %c0_12 = arith.constant 0 : index
      %19 = vector.load %arg9[%c0_11, %c0_12] : memref<32x32xf32, #tpu.memory_space<vmem>>, vector<32x32xf32>
      %cst = arith.constant dense<0.000000e+00> : vector<8x32xf32>
      %20 = tpu.matmul %18, %19, %cst {dimension_numbers = #tpu.dot_dimension_numbers<[1], [0], [0], [1], [0, 0, 1, 1], [], []>} : vector<8x32xf32>, vector<32x32xf32>, vector<8x32xf32> -> vector<8x32xf32>
      %c0_13 = arith.constant 0 : index
      %c0_14 = arith.constant 0 : index
      %21 = vector.load %arg10[%c0_13, %c0_14] : memref<1x32xf32, #tpu.memory_space<vmem>>, vector<1x32xf32>
      %22 = vector.broadcast %21 : vector<1x32xf32> to vector<8x32xf32>
      %23 = arith.addf %20, %22 : vector<8x32xf32>
      %c0_15 = arith.constant 0 : index
      %c0_16 = arith.constant 0 : index
      %c0_17 = arith.constant 0 : index
      %24 = vector.load %arg11[%c0_15, %c0_16, %c0_17] : memref<1x8x32xf32, #tpu.memory_space<vmem>>, vector<1x8x32xf32>
      %25 = vector.shape_cast %24 : vector<1x8x32xf32> to vector<8x32xf32>
      %26 = vector.shape_cast %23 : vector<8x32xf32> to vector<1x8x32xf32>
      tpu.vector_store %arg11[%c0_15, %c0_16, %c0_17], %26 {strides = array<i32>} : memref<1x8x32xf32, #tpu.memory_space<vmem>>, vector<1x8x32xf32>,
    } else {
    }
    return
  }
  func.func @transform_0(%arg0: i32, %arg1: i32, %arg2: i32) -> (i32, i32, i32) {
    %c0_i32 = arith.constant 0 : i32
    %c0_i32_0 = arith.constant 0 : i32
    return %arg0, %arg1, %c0_i32 : i32, i32, i32
  }
  func.func @transform_1(%arg0: i32, %arg1: i32, %arg2: i32) -> (i32, i32, i32) {
    %c0_i32 = arith.constant 0 : i32
    %c0_i32_0 = arith.constant 0 : i32
    return %arg0, %arg2, %c0_i32 : i32, i32, i32
  }
  func.func @transform_2(%arg0: i32, %arg1: i32, %arg2: i32) -> (i32, i32) {
    %c0_i32 = arith.constant 0 : i32
    %c0_i32_0 = arith.constant 0 : i32
    %c0_i32_1 = arith.constant 0 : i32
    return %c0_i32, %c0_i32_0 : i32, i32
  }
  func.func @transform_3(%arg0: i32, %arg1: i32, %arg2: i32) -> (i32, i32) {
    %c0_i32 = arith.constant 0 : i32
    %c0_i32_0 = arith.constant 0 : i32
    %c0_i32_1 = arith.constant 0 : i32
    return %c0_i32, %c0_i32_0 : i32, i32
  }
  func.func @transform_4(%arg0: i32, %arg1: i32, %arg2: i32) -> (i32, i32) {
    %c0_i32 = arith.constant 0 : i32
    %c0_i32_0 = arith.constant 0 : i32
    %c0_i32_1 = arith.constant 0 : i32
    return %c0_i32, %c0_i32_0 : i32, i32
  }
  func.func @transform_5(%arg0: i32, %arg1: i32, %arg2: i32) -> (i32, i32) {
    %c0_i32 = arith.constant 0 : i32
    %c0_i32_0 = arith.constant 0 : i32
    %c0_i32_1 = arith.constant 0 : i32
    return %c0_i32, %c0_i32_0 : i32, i32
  }
  func.func @transform_6(%arg0: i32, %arg1: i32, %arg2: i32) -> (i32, i32) {
    %c0_i32 = arith.constant 0 : i32
    %c0_i32_0 = arith.constant 0 : i32
    %c0_i32_1 = arith.constant 0 : i32
    return %c0_i32, %c0_i32_0 : i32, i32
  }
  func.func @transform_7(%arg0: i32, %arg1: i32, %arg2: i32) -> (i32, i32) {
    %c0_i32 = arith.constant 0 : i32
    %c0_i32_0 = arith.constant 0 : i32
    %c0_i32_1 = arith.constant 0 : i32
    return %c0_i32, %c0_i32_0 : i32, i32
  }
  func.func @transform_8(%arg0: i32, %arg1: i32, %arg2: i32) -> (i32, i32, i32) {
    %c0_i32 = arith.constant 0 : i32
    %c0_i32_0 = arith.constant 0 : i32
    return %arg0, %arg1, %c0_i32 : i32, i32, i32
  }
}

</mosaic_0001>

<bundles_post_ra>
// kernel: tpu_custom_call.1
= control target key start
LH: loop header
LB: loop body
LE: loop exit
PB: predicated region body
PF: predicated region fallthrough
CT: control target
= control target key end

     0   :  { %s2582_s0 = inlined_call_operand.hbm [shape: f32[2,8,32], index: 0, kind: input, shape index: {}]   ;;  %s2583_s1 = inlined_call_operand.hbm [shape: f32[2,8,32], index: 1, kind: input, shape index: {}]   ;;  %s2584_s2 = inlined_call_operand.hbm [shape: f32[32,32], index: 2, kind: input, shape index: {}]   ;;  %s2585_s3 = inlined_call_operand.vmem [shape: f32[1,32], index: 3, kind: input, shape index: {}]   ;;  %s2586_s4 = inlined_call_operand.hbm [shape: f32[32,64], index: 4, kind: input, shape index: {}]   ;;  %s2587_s5 = inlined_call_operand.vmem [shape: f32[1,64], index: 5, kind: input, shape index: {}]   ;;  %s2588_s6 = inlined_call_operand.hbm [shape: f32[32,32], index: 6, kind: input, shape index: {}]   ;;  %s2589_s7 = inlined_call_operand.vmem [shape: f32[1,32], index: 7, kind: input, shape index: {}]   ;;  %s2590_s8 = inlined_call_operand.hbm [shape: f32[2,8,32], index: 8, kind: output, shape index: {}]  }
   0x1   :  { %2596 = sst [smem:[#allocation27_spill]] %s2584_s2 }
   0x2   :  { %2597 = sst [smem:[#allocation28_spill]] %s2586_s4 }
   0x3   :  { %2598 = sst [smem:[#allocation29_spill]] %s2588_s6 }
   0x4   :  { %13 = vsyncpa [#allocation7], 0 }
   0x5   :  { %15 = vsyncpa [#allocation7 + $0x1], 0 }
   0x6   :  { %16 = vsyncpa [#allocation10], 0 }
   0x7   :  { %18 = vsyncpa [#allocation10 + $0x1], 0 }
   0x8   :  { %19 = vsyncpa [#allocation13], 0 }
   0x9   :  { %20 = vsyncpa [#allocation8], 0 }
   0xa   :  { %22 = vsyncpa [#allocation8 + $0x1], 0  ;;  %s2092_s27 = smov 0   ;;  %s2094_s28 = smov 0  }
   0xb   :  { %s2096_s29 = smov 0   ;;  %s2098_s30 = smov 0  }
   0xc   :  { %s2100_s9 = smov 0   ;;  %s2102_s10 = smov 0  }
   0xd LB: > { %2599 = sst [smem:[#allocation21_spill]] %s2008_s27  ;;  %s2123_s11 = sadd.s32 4294967295, %s2028_s10   ;;  %s2028_s10 = sphi %s2102_s10, %s28_s10   ;;  %s2024_s9 = sphi %s2100_s9, %s2619_s9   ;;  %s2020_s30 = sphi %s2098_s30, %s2618_s30   ;;  %s2016_s29 = sphi %s2096_s29, %s2617_s29   ;;  %s2012_s28 = sphi %s2094_s28, %s2621_s28   ;;  %s2008_s27 = sphi %s2092_s27, %s2620_s27  }
   0xe   : > { %2600 = sst [smem:[#allocation22_spill]] %s2016_s29  ;;  %p1597_p0 = scmp.ge.s32.totalorder %s2028_s10, 1 }
   0xf   : > { %2601 = sst [smem:[#allocation23_spill]] %s2024_s9  ;;  %p70_p1 = scmp.eq.s32.totalorder %s2123_s11, 0 }
  0x10   : > { %p262_p2 = scmp.lt.s32.totalorder %s2028_s10, 3  ;;  %s2602_s2 = sld [smem:[#allocation27_spill]] }
  0x11   : > { %s2030_s16 = smov [#allocation11]   ;;  %p1601_p6 = scmp.ge.s32.totalorder %s2028_s10, 2 }
  0x12   : > { %p2131_p3 = pnand %p1597_p0, %p262_p2  ;;  %s275_s17 = sshll.u32 %s2030_s16, 4  ;;  %s276_s17 = int_to_ptr.vmem [resolvable:$true] %s275_s17 }
  0x13   : > { %s2605_s4 = sld [smem:[#allocation28_spill]]  ;;  %s2031_s22 = smov 128  }
  0x14   : > { %p1650_p4 = pneg %p2131_p3  ;;  %s2032_s23 = smov 8  }
  0x15   : > { %s2033_s24 = smov [#allocation12]   ;;  %s2606_s6 = sld [smem:[#allocation29_spill]] }
  0x16   : > { %s273_s14 = sshll.u32 %s2602_s2, 4  ;;  %p2139_p5 = pnand %p1650_p4, %p70_p1  ;;  %s274_s14 = int_to_ptr.hbm [resolvable:$true] %s273_s14 }
  0x17   : > { %s292_s25 = sshll.u32 %s2033_s24, 4  ;;  %s2034_s16 = smov [#allocation14]   ;;  %s293_s25 = int_to_ptr.vmem [resolvable:$true] %s292_s25 }
  0x18   : > { %1653 = dma.hbm_to_vmem [thread:$0]  (!%p2139_p5), %s274_s14, 512, %s276_s17, [#allocation10], %s2031_s22, %s2031_s22, %s2032_s23  }
  0x19   : > { %s290_s21 = sshll.u32 %s2605_s4, 4  ;;  %s309_s19 = sshll.u32 %s2034_s16, 4  ;;  %s291_s21 = int_to_ptr.hbm [resolvable:$true] %s290_s21  ;;  %s310_s19 = int_to_ptr.vmem [resolvable:$true] %s309_s19 }
  0x1a   : > { %1656 = dma.hbm_to_vmem [thread:$0]  (!%p2139_p5), %s291_s21, 512, %s293_s25, [#allocation13], %s2031_s22, %s2031_s22, %s2032_s23  }
  0x1b   : > { %s307_s13 = sshll.u32 %s2606_s6, 4  ;;  %s1596_s14 = sadd.s32 4294967294, %s2028_s10   ;;  %s308_s13 = int_to_ptr.hbm [resolvable:$true] %s307_s13 }
  0x1c   : > { %1659 = dma.hbm_to_vmem [thread:$0]  (!%p2139_p5), %s308_s13, 512, %s310_s19, [#allocation13], %s2031_s22, %s2031_s22, %s2032_s23  }
  0x1d   : > { %s47_s17 = sadd.s32 1, %s2024_s9  ;;  %s56_s20 = sadd.s32 1, %s2016_s29 }
  0x1e   : > { %p49_p7 = scmp.ge.s32.totalorder %s47_s17, 2  ;;  %p63_p8 = scmp.ne.s32.totalorder %s2016_s29, %s2012_s28 }
  0x1f   : > { %p64_p9 = scmp.eq.s32.totalorder %s2028_s10, 0  ;;  %p69_p10 = scmp.ne.s32.totalorder %s2012_s28, %s2008_s27 }
  0x20   : > { %s2623_s17 = smov (%p49_p7, %s47_s17), 0  ;;  %p249_p13 = scmp.eq.s32.totalorder %s2123_s11, 1 }
  0x21   : > { %2607 = sst [smem:[#allocation24_spill]] %s2623_s17  ;;  %p2166_p11 = por %p64_p9, %p63_p8 }
  0x22   : > { %p2172_p12 = por %p70_p1, %p69_p10  ;;  %s51_s22 = ssub.s32 %s2024_s9, %s2623_s17 }
  0x23   : > { %p54_p0 = scmp.eq.s32.totalorder %s51_s22, 0  ;;  %p255_p2 = scmp.eq.s32.totalorder %s1596_s14, 1 }
  0x24   : > { %p2179_p4 = por %p249_p13, %p63_p8  ;;  %p1674_p5 = scmp.lt.s32.totalorder %s2028_s10, 2 }
  0x25   : > { %s2185_s24 = scalar_select %p54_p0, %s2016_s29, %s56_s20  }
  0x26   : > { %p2187_p7 = por %p255_p2, %p69_p10  ;;  %s326_s26 = sand.u32 1, %s2016_s29  }
  0x27   : > { %2611 = sst [smem:[#allocation25_spill]] %s2185_s24  ;;  %s1602_s12 = sshll.u32 %s326_s26, 3 }
  0x28   : > { %s2612_s25 = scalar_select %p2187_p7, 1, 0 }
  0x29   : > { %s1603_s13 = sshll.u32 %s2024_s9, 3  ;;  %s330_s14 = scalar_lea.vmem [#allocation6], %s1602_s12 }
  0x2a   : > { %2613 = sst [smem:[#allocation26_spill]] %s2612_s25  ;;  %s335_s22 = scalar_lea.hbm %s2582_s0, %s1603_s13 }
  0x2b   : > { %s339_s2 = sshll.u32 %s330_s14, 4  ;;  %s337_s4 = sshll.u32 %s335_s22, 4  ;;  %s340_s2 = int_to_ptr.vmem [resolvable:$true] %s339_s2  ;;  %s338_s4 = int_to_ptr.hbm [resolvable:$true] %s337_s4 }
  0x2c   : > { %p1661_p8 = pnand %p1674_p5, %p2166_p11  ;;  %s355_s17 = scalar_lea.hbm %s2583_s1, %s1603_s13 }
  0x2d   : > { %s346_s24 = sand.u32 1, %s2028_s10   ;;  %s327_s25 = scalar_lea.sflag [#allocation7], %s326_s26 }
  0x2e   : > { %1663 = dma.hbm_to_vmem [thread:$0]  (!%p1661_p8), %s338_s4, 128, %s340_s2, %s327_s25  }
  0x2f   : > { %s357_s29 = sshll.u32 %s355_s17, 4  ;;  %s350_s9 = scalar_lea.vmem [#allocation9], %s1602_s12  ;;  %s358_s29 = int_to_ptr.hbm [resolvable:$true] %s357_s29 }
  0x30   : > { %s359_s27 = sshll.u32 %s350_s9, 4  ;;  %s347_s16 = scalar_lea.sflag [#allocation10], %s346_s24  ;;  %s360_s27 = int_to_ptr.vmem [resolvable:$true] %s359_s27 }
  0x31   : > { %1666 = dma.hbm_to_vmem [thread:$0]  (!%p1661_p8), %s358_s29, 128, %s360_s27, %s347_s16  }
  0x32   : > { %368 = sbr.rel (%p2131_p3) target bundleno = 1271 (0x4f7), region = 52  ;;  %s2205_s21 = sand.u32 (!%p2131_p3), 1, %s2012_s28  }
  0x33   : > { %s2208_s6 = sshll.u32 (!%p2131_p3), %s2205_s21, 3  ;;  %s371_s2 = scalar_lea.sflag (!%p2131_p3), [#allocation7], %s2205_s21 }
  0x34   : > { %s374_s4 = scalar_lea.vmem (!%p2131_p3), [#allocation6], %s2208_s6 }
  0x37   : > { %1987 = dma.done.wait (%p2172_p12), %s371_s2, 128  }
  0x38   : > { %1989 = vsyncadd (%p2172_p12), %s371_s2, 4294967168  ;;  %s380_s27 = sand.u32 1, %s2123_s11   ;;  %s384_s9 = scalar_lea.vmem [#allocation9], %s2208_s6 }
  0x39   : > { %s381_s29 = scalar_lea.sflag [#allocation10], %s380_s27 }
  0x3a   : > { %1991 = dma.done.wait (%p2172_p12), %s381_s29, 128  }
  0x3b   : > { %1993 = vsyncadd (%p2172_p12), %s381_s29, 4294967168 }
  0x3c   : > { %1995 = dma.done.wait (%p70_p1), [#allocation10], 512  }
  0x3d   : > { %1997 = vsyncadd (%p70_p1), [#allocation10], 4294966784 }
  0x3e   : > { %1999 = dma.done.wait (%p70_p1), [#allocation13], 1024  }
  0x3f   : > { %2001 = vsyncadd (%p70_p1), [#allocation13], 4294966272  ;;  %v448_v0 = vld [vmem:[#allocation11 + $0x18] sm:$0xff]  ;;  %v447_v2 = vld [vmem:[#allocation11 + $0x10] sm:$0xff]  ;;  %vm453_vm0 = vcmask 261120   ;;  %s2035_s24 = smov 112  }
  0x40   : > { %v626_v1 = vld [vmem:[#allocation12 + $0x18] sm:$0xff]  ;;  %469 = vmatpush.msra.mxu0 %v448_v0  ;;  %v625_v3 = vld [vmem:[#allocation12 + $0x10] sm:$0xff]  ;;  %v446_v4 = vld [vmem:[#allocation11 + $0x8] sm:$0xff]  ;;  %s2036_s25 = smov 104   ;;  %s2037_s26 = smov 120   ;;  %vm489_vm1 = vcmask 1047556  }
  0x41   : > { %647 = vmatpush.msra.mxu1 %v626_v1  ;;  %v624_v5 = vld [vmem:[#allocation12 + $0x8] sm:$0xff]  ;;  %v445_v6 = vld [vmem:[#allocation11] sm:$0xff]  ;;  %v622_v9 = vld [vmem:[%s384_s9] sm:$0xff]  ;;  %v2038_v18 = vmov 1983009808   ;;  %vm599_vm2 = vcmask 64512  }
  0x42   : > { %470 = vmatpush.msra.mxu0 %v447_v2  ;;  %v623_v7 = vld [vmem:[#allocation12] sm:$0xff]  ;;  %v494_v19 = vunpack.c.l.s4 %v2038_v18  ;;  %v2039_v32 = vmov 1934713408   ;;  %vm604_vm4 = vcmask 7168   ;;  %s2041_s12 = smov 96   ;;  %s2044_s13 = smov 16  }
  0x43   : > { %648 = vmatpush.msra.mxu1 %v625_v3  ;;  %v444_v8 = vld [vmem:[%s374_s4] sm:$0xff]  ;;  %v518_v33 = vunpack.c.l.s4 %v2039_v32  ;;  %s2045_s19 = smov 24   ;;  %s2046_s22 = smov 8   ;;  %vm1406_vm5 = vcmask 130048   ;;  %vm1408_vm6 = vcmask 195584  }
  0x44   : > { %471 = vmatpush.msra.mxu0 %v446_v4  ;;  %v1757_v10 = vld [vmem:[%s2585_s3] ss:$0 sm:$0xff]  ;;  %v2247_v24 = vunpack.c.0.s8 %v494_v19  ;;  %s1629_s14 = sshll.u32 %s2020_s30, 3  ;;  %s437_s29 = scalar_lea.vmem [#allocation15], %s2208_s6 }
  0x45   : > { %649 = vmatpush.msra.mxu1 %v624_v5  ;;  %v1758_v11 = vld [vmem:[%s2587_s5] ss:$0 sm:$0xff]  ;;  %v2262_v39 = vunpack.c.0.s8 %v518_v33  ;;  %s1455_s2 = scalar_lea.hbm %s2590_s8, %s1629_s14  ;;  %s1457_s9 = sshll.u32 %s437_s29, 4  ;;  %s1458_s9 = int_to_ptr.vmem [resolvable:$true] %s1457_s9 }
  0x46   : > { %472 = vmatpush.msra.mxu0 %v445_v6  ;;  %s1459_s11 = sshll.u32 %s1455_s2, 4  ;;  %s1444_s15 = scalar_lea.sflag [#allocation8], %s2205_s21  ;;  %s1460_s11 = int_to_ptr.hbm [resolvable:$true] %s1459_s11 }
  0x47   : > { %650 = vmatpush.msra.mxu1 %v623_v7  ;;  %1613 = vmatmul.msk.f32.vlgmr.msra.gmra.mxu0 %vm453_vm0, %v444_v8  ;;  %s1948_s30 = sshra.s32 %s1460_s11, 4  ;;  %s1954_s6 = scalar_lea.hbm %s2590_s8, 16  ;;  %s1949_s30 = int_to_ptr.hbm [resolvable:$true] %s1948_s30 }
  0x48   : > { %1614 = vmatmul.msk.f32.vlgmr.msra.gmra.mxu1 %vm453_vm0, %v622_v9  ;;  %s1950_s17 = scalar_lea.hbm %s1949_s30, 8  ;;  %p1955_p10 = scmp.lt.s32.totalorder %s1949_s30, %s2590_s8 }
  0x49   : > { %p1951_p1 = scmp.ne.s32.totalorder %s1949_s30, %s1950_s17  ;;  %p1956_p11 = scmp.lt.s32.totalorder %s1954_s6, %s1950_s17 }
  0x4b   : > { %p1952_p3 = pnand %p1951_p1, %p2179_p4  ;;  %p1957_p12 = por %p1956_p11, %p1955_p10 }
  0x4d   : > { %p1953_p9 = pneg %p1952_p3 }
  0x4f   : > { %p1958_p13 = pnand %p1957_p12, %p1953_p9 }
  0xc4   : > { %v474_v12 = vpop.f32.mrf.mxu0 }
  0xc5   : > { %v652_v13 = vpop.f32.mrf.mxu1  ;;  %v475_v14 = vadd.f32 %v1757_v10, %v474_v12 }
  0xc6   : > { %v2238_v15 = vadd.f32 %v1758_v11, %v652_v13 }
  0xc7   : > { %v477_v16 = vmul.f32 0.17677669, %v475_v14 }
  0xc8   : > { %659 = vrot.lane.b32.xlu2 %v2238_v15, %s2035_s24  ;;  %v668_v21 = vrot.slane %v2238_v15, 4 }
  0xc9   : > { %485 = vrot.lane.b32.xlu1 %v477_v16, %s2036_s25  ;;  %479 = vrot.lane.b32.xlu0 %v477_v16, %s2037_s26  ;;  %v491_v42 = vrot.slane %v477_v16, 4 }
  0xd0   : > { %662 = vrot.lane.b32.xlu2 %v2238_v15, %s2036_s25 }
  0xd1   : > { %656 = vrot.lane.b32.xlu1 %v2238_v15, %s2037_s26  ;;  %482 = vrot.lane.b32.xlu0 %v477_v16, %s2035_s24 }
 0x122   : > { %v2243_v17 = vpop.permute.xlu2 %659 }
 0x123   : > { %v665_v20 = vrot.slane %v2243_v17, 4  ;;  %v669_v27 = vsel %vm489_vm1, %v2243_v17, %v668_v21 }
 0x124   : > { %v677_v34 = vperm.slane %v669_v27, %v2247_v24 }
 0x125   : > { %v667_v28 = vsel %vm489_vm1, %v665_v20, %v2238_v15 }
 0x126   : > { %v673_v35 = vperm.slane %v667_v28, %v2247_v24  ;;  %v704_v43 = vrot.slane %v677_v34, 4 }
 0x128   : > { %v692_v47 = vrot.slane %v673_v35, 4 }
 0x12a   : > { %v2254_v30 = vpop.permute.xlu2 %662 }
 0x12b   : > { %v678_v37 = vrot.slane %v2254_v30, 4 }
 0x13b   : > { %v486_v22 = vpop.permute.xlu1 %485  ;;  %v480_v23 = vpop.permute.xlu0 %479 }
 0x13c   : > { %v501_v25 = vrot.slane %v486_v22, 4  ;;  %v503_v26 = vrot.slane %v480_v23, 4 }
 0x13e   : > { %v502_v29 = vsel %vm489_vm1, %v501_v25, %v480_v23  ;;  %v504_v31 = vsel %vm489_vm1, %v486_v22, %v503_v26 }
 0x13f   : > { %v508_v36 = vperm.slane %v502_v29, %v2247_v24  ;;  %v512_v38 = vperm.slane %v504_v31, %v2247_v24 }
 0x141   : > { %v513_v48 = vrot.slane %v508_v36, 4  ;;  %v525_v51 = vrot.slane %v512_v38, 4 }
 0x143   : > { %v2264_v40 = vpop.permute.xlu1 %656  ;;  %v483_v41 = vpop.permute.xlu0 %482 }
 0x144   : > { %v679_v44 = vsel %vm489_vm1, %v678_v37, %v2264_v40  ;;  %v680_v45 = vrot.slane %v2264_v40, 4  ;;  %v488_v46 = vrot.slane %v483_v41, 4  ;;  %v492_v50 = vsel %vm489_vm1, %v483_v41, %v491_v42 }
 0x145   : > { %v685_v49 = vperm.slane %v679_v44, %v2247_v24  ;;  %v500_v54 = vperm.slane %v492_v50, %v2247_v24 }
 0x146   : > { %v681_v52 = vsel %vm489_vm1, %v2254_v30, %v680_v45  ;;  %v490_v53 = vsel %vm489_vm1, %v488_v46, %v477_v16 }
 0x147   : > { %v689_v55 = vperm.slane %v681_v52, %v2247_v24  ;;  %v690_v56 = vrot.slane %v685_v49, 4  ;;  %v693_v57 = vsel %vm489_vm1, %v685_v49, %v692_v47  ;;  %v496_v58 = vperm.slane %v490_v53, %v2247_v24 }
 0x148   : > { %v701_v59 = vperm.slane %v693_v57, %v2262_v39  ;;  %v526_v60 = vsel %vm489_vm1, %v525_v51, %v500_v54  ;;  %v527_v61 = vrot.slane %v500_v54, 4 }
 0x149   : > { %v691_v62 = vsel %vm489_vm1, %v690_v56, %v673_v35  ;;  %v702_v63 = vrot.slane %v689_v55, 4  ;;  %v705_v0 = vsel %vm489_vm1, %v689_v55, %v704_v43  ;;  %v514_v1 = vsel %vm489_vm1, %v513_v48, %v496_v58 }
 0x14a   : > { %v697_v2 = vperm.slane %v691_v62, %v2262_v39  ;;  %v713_v3 = vperm.slane %v705_v0, %v2262_v39  ;;  %v716_v4 = vrot.slane %v701_v59, 4  ;;  %v515_v5 = vrot.slane %v496_v58, 4 }
 0x14b   : > { %v703_v6 = vsel %vm489_vm1, %v702_v63, %v677_v34  ;;  %v520_v7 = vperm.slane %v514_v1, %v2262_v39  ;;  %v528_v8 = vsel %vm489_vm1, %v512_v38, %v527_v61  ;;  %v532_v9 = vperm.slane %v526_v60, %v2262_v39 }
 0x14c   : > { %v714_v10 = vrot.slane %v697_v2, 4  ;;  %v717_v11 = vsel %vm489_vm1, 0.0, %v716_v4  ;;  %v720_v12 = vrot.slane %v713_v3, 4  ;;  %v516_v13 = vsel %vm489_vm1, %v508_v36, %v515_v5 }
 0x14d   : > { %v727_v14 = vrot.slane %v717_v11, 4  ;;  %v524_v16 = vperm.slane %v516_v13, %v2262_v39  ;;  %v536_v18 = vperm.slane %v528_v8, %v2262_v39  ;;  %v537_v19 = vrot.slane %v520_v7, 4 }
 0x14e   : > { %v715_v20 = vsel %vm489_vm1, 0.0, %v714_v10  ;;  %v721_v21 = vsel %vm489_vm1, 0.0, %v720_v12  ;;  %v541_v22 = vrot.slane %v532_v9, 4  ;;  %v709_v23 = vperm.slane %v703_v6, %v2262_v39 }
 0x14f   : > { %v738_v25 = vrot.slane %v721_v21, 4  ;;  %v538_v26 = vsel %vm489_vm1, 0.0, %v537_v19  ;;  %v539_v27 = vrot.slane %v524_v16, 4  ;;  %v543_v28 = vrot.slane %v536_v18, 4 }
 0x150   : > { %v542_v29 = vsel %vm489_vm1, 0.0, %v541_v22  ;;  %v718_v31 = vrot.slane %v709_v23, 4  ;;  %v722_v32 = vsel %vm489_vm1, %v716_v4, %v697_v2  ;;  %v728_v33 = vsel %vm489_vm1, %v727_v14, %v715_v20 }
 0x151   : > { %v540_v34 = vsel %vm489_vm1, 0.0, %v539_v27  ;;  %v544_v35 = vsel %vm489_vm1, 0.0, %v543_v28  ;;  %v545_v36 = vsel %vm489_vm1, %v539_v27, %v520_v7  ;;  %v556_v37 = vsel %vm489_vm1, %v543_v28, %v532_v9 }
 0x152   : > { %v549_v38 = vperm.slane %v545_v36, %v2247_v24  ;;  %v550_v41 = vrot.slane %v540_v34, 4  ;;  %v560_v42 = vperm.slane %v556_v37, %v2247_v24  ;;  %v561_v43 = vrot.slane %v544_v35, 4 }
 0x153   : > { %v719_v44 = vsel %vm489_vm1, 0.0, %v718_v31  ;;  %v726_v45 = vperm.slane %v722_v32, %v2247_v24  ;;  %v732_v46 = vperm.slane %v728_v33, %v2247_v24  ;;  %v733_v47 = vsel %vm489_vm1, %v720_v12, %v709_v23 }
 0x154   : > { %v551_v48 = vsel %vm489_vm1, %v550_v41, %v538_v26  ;;  %v562_v49 = vsel %vm489_vm1, %v561_v43, %v542_v29  ;;  %v569_v50 = vrot.slane %v549_v38, 4  ;;  %v581_v51 = vrot.slane %v560_v42, 4 }
 0x155   : > { %v555_v52 = vperm.slane %v551_v48, %v2247_v24  ;;  %v566_v53 = vperm.slane %v562_v49, %v2247_v24  ;;  %v739_v54 = vsel %vm489_vm1, %v738_v25, %v719_v44  ;;  %v737_v55 = vperm.slane %v733_v47, %v2247_v24 }
 0x156   : > { %v743_v56 = vperm.slane %v739_v54, %v2247_v24  ;;  %v744_v57 = vrot.slane %v732_v46, 4  ;;  %v746_v58 = vrot.slane %v726_v45, 4  ;;  %v902_v41 = vlaneseq }
 0x157   : > { %v567_v59 = vrot.slane %v555_v52, 4  ;;  %v570_v60 = vsel %vm489_vm1, %v555_v52, %v569_v50  ;;  %v579_v61 = vrot.slane %v566_v53, 4  ;;  %v582_v62 = vsel %vm489_vm1, %v566_v53, %v581_v51 }
 0x158   : > { %v578_v63 = vperm.slane %v570_v60, %v2262_v39  ;;  %v590_v0 = vperm.slane %v582_v62, %v2262_v39  ;;  %v745_v1 = vsel %vm489_vm1, %v744_v57, %v726_v45  ;;  %v756_v2 = vrot.slane %v743_v56, 4 }
 0x159   : > { %v568_v3 = vsel %vm489_vm1, %v567_v59, %v549_v38  ;;  %v580_v4 = vsel %vm489_vm1, %v579_v61, %v560_v42  ;;  %v751_v5 = vperm.slane %v745_v1, %v2262_v39  ;;  %v747_v6 = vsel %vm489_vm1, %v732_v46, %v746_v58 }
 0x15a   : > { %v574_v7 = vperm.slane %v568_v3, %v2262_v39  ;;  %v586_v8 = vperm.slane %v580_v4, %v2262_v39  ;;  %v595_v9 = vrot.slane %v590_v0, 4  ;;  %v597_v10 = vrot.slane %v578_v63, 4 }
 0x15b   : > { %v757_v11 = vsel %vm489_vm1, %v756_v2, %v737_v55  ;;  %v770_v12 = vrot.slane %v751_v5, 4  ;;  %v755_v13 = vperm.slane %v747_v6, %v2262_v39  ;;  %v758_v14 = vrot.slane %v737_v55, 4 }
 0x15c   : > { %v591_v16 = vrot.slane %v586_v8, 4  ;;  %v593_v18 = vrot.slane %v574_v7, 4  ;;  %v596_v19 = vsel %vm489_vm1, %v595_v9, %v578_v63  ;;  %v598_v20 = vsel %vm489_vm1, %v590_v0, %v597_v10 }
 0x15d   : > { %602 = vst.msk [vmem:[#allocation2 + $0x10] sm:$0xff] %vm599_vm2, %v596_v19  ;;  %v763_v21 = vperm.slane %v757_v11, %v2262_v39  ;;  %v759_v22 = vsel %vm489_vm1, %v743_v56, %v758_v14  ;;  %v774_v23 = vrot.slane %v755_v13, 4  ;;  %v903_v42 = vshrl.u32 %v902_v41, 7 }
 0x15e   : > { %v592_v25 = vsel %vm489_vm1, %v591_v16, %v574_v7  ;;  %v594_v26 = vsel %vm489_vm1, %v586_v8, %v593_v18  ;;  %603 = vst.msk [vmem:[#allocation2 + $0x18] sm:$0xff] %vm599_vm2, %v598_v20  ;;  %v767_v27 = vperm.slane %v759_v22, %v2262_v39  ;;  %v907_v43 = vand.u32 127, %v902_v41 }
 0x15f   : > { %600 = vst.msk [vmem:[#allocation2] sm:$0xff] %vm599_vm2, %v592_v25  ;;  %v771_v28 = vsel %vm489_vm1, %v763_v21, %v770_v12  ;;  %v768_v29 = vrot.slane %v763_v21, 4  ;;  %v2040_v44 = vmov -1e+30   ;;  %v1744_v58 = vpack.i.bf16 %v2264_v40, %v2238_v15 }
 0x160   : > { %601 = vst.msk [vmem:[#allocation2 + $0x8] sm:$0xff] %vm599_vm2, %v594_v26  ;;  %1617 = vmatpush.xpose.msk.msra.mxu3 %vm599_vm2, %v771_v28  ;;  %v775_v31 = vsel %vm489_vm1, %v767_v27, %v774_v23  ;;  %v772_v32 = vrot.slane %v767_v27, 4  ;;  %vm910_vm3 = vcmp.le.s32.totalorder %v907_v43, %v903_v42  ;;  %v1749_v59 = vpack.i.bf16 %v2254_v30, %v2243_v17 }
 0x161   : > { %v769_v33 = vsel %vm489_vm1, %v768_v29, %v751_v5  ;;  %v911_v45 = vsel %vm910_vm3, 0.0, %v2040_v44  ;;  %605 = vst.msk [vmem:[#allocation3] sm:$0xff] %vm604_vm4, %v2040_v44  ;;  %v2042_v60 = vmov 0   ;;  %v2043_v61 = vmov 0.0  }
 0x162   : > { %1615 = vmatpush.xpose.msk.msra.mxu2 %vm599_vm2, %v769_v33  ;;  %v773_v34 = vsel %vm489_vm1, %v772_v32, %v755_v13  ;;  %606 = vst.msk [vmem:[#allocation3 + $0x8] sm:$0xff] %vm604_vm4, %v2040_v44  ;;  %1756 = vset.pattern.permute.xlu1 %v2042_v60 }
 0x163   : > { %607 = vst.msk [vmem:[#allocation3 + $0x10] sm:$0xff] %vm604_vm4, %v2040_v44  ;;  %1754 = vset.pattern.permute.xlu2 %v2042_v60  ;;  %1755 = vset.pattern.permute.xlu0 %v2042_v60 }
 0x164   : > { %1621 = vmatpush.xpose.msk.msrb.mxu3 %vm599_vm2, %v775_v31  ;;  %v900_v37 = vld [vmem:[#allocation2 + $0x10] sm:$0xff]  ;;  %608 = vst.msk [vmem:[#allocation3 + $0x18] sm:$0xff] %vm604_vm4, %v2040_v44 }
 0x165   : > { %v901_v38 = vld [vmem:[#allocation2 + $0x18] sm:$0xff]  ;;  %611 = vst.msk [vmem:[#allocation4 + $0x10] sm:$0xff] %vm604_vm4, %v2043_v61 }
 0x166   : > { %1619 = vmatpush.xpose.msk.msrb.mxu2 %vm599_vm2, %v773_v34  ;;  %v898_v35 = vld [vmem:[#allocation2] sm:$0xff]  ;;  %609 = vst.msk [vmem:[#allocation4] sm:$0xff] %vm604_vm4, %v2043_v61 }
 0x167   : > { %1616 = vmatmul.msk.f32.vlgmr.msra.gmra.mxu2 %vm599_vm2, %v898_v35  ;;  %v899_v36 = vld [vmem:[#allocation2 + $0x8] sm:$0xff]  ;;  %610 = vst.msk [vmem:[#allocation4 + $0x8] sm:$0xff] %vm604_vm4, %v2043_v61 }
 0x168   : > { %1618 = vmatmul.msk.f32.vlgmr.msra.gmra.mxu3 %vm599_vm2, %v899_v36  ;;  %612 = vst.msk [vmem:[#allocation4 + $0x18] sm:$0xff] %vm604_vm4, %v2043_v61  ;;  %v2385_v15 = vld [vmem:[#allocation3] sm:$0xff] }
 0x169   : > { %613 = vst.msk [vmem:[#allocation5] sm:$0xff] %vm599_vm2, %v2043_v61  ;;  %v2397_v63 = vld [vmem:[#allocation3 + $0x8] sm:$0xff] }
 0x16a   : > { %614 = vst.msk [vmem:[#allocation5 + $0x8] sm:$0xff] %vm599_vm2, %v2043_v61  ;;  %v2395_v62 = vld [vmem:[#allocation3 + $0x10] sm:$0xff] }
 0x16b   : > { %615 = vst.msk [vmem:[#allocation5 + $0x10] sm:$0xff] %vm599_vm2, %v2043_v61  ;;  %v2399_v0 = vld [vmem:[#allocation3 + $0x18] sm:$0xff] }
 0x16c   : > { %616 = vst.msk [vmem:[#allocation5 + $0x18] sm:$0xff] %vm599_vm2, %v2043_v61 }
 0x16f   : > { %1620 = vmatmul.msk.f32.vlgmr.msrb.gmra.mxu2 %vm599_vm2, %v900_v37 }
 0x170   : > { %1622 = vmatmul.msk.f32.vlgmr.msrb.gmra.mxu3 %vm599_vm2, %v901_v38 }
 0x1ea   : > { %v936_v46 = vpop.f32.mrf.mxu2 }
 0x1eb   : > { %v2353_v47 = vadd.f32 %v936_v46, %v911_v45  ;;  %v962_v48 = vpop.f32.mrf.mxu3 }
 0x1ec   : > { %v2357_v50 = vadd.f32 %v962_v48, %v911_v45 }
 0x1ed   : > { %v1021_v49 = vsel %vm599_vm2, %v2353_v47, -inf }
 0x1ee   : > { %1022 = vmax.xlane.f32.xlu2 %v1021_v49  ;;  %v1024_v56 = vsel %vm599_vm2, %v2357_v50, -inf }
 0x1f2   : > { %v988_v51 = vpop.f32.mrf.mxu2 }
 0x1f3   : > { %v2361_v52 = vadd.f32 %v988_v51, %v911_v45  ;;  %v1014_v53 = vpop.f32.mrf.mxu3 }
 0x1f4   : > { %v2364_v54 = vadd.f32 %v1014_v53, %v911_v45 }
 0x1f5   : > { %v1027_v55 = vsel %vm599_vm2, %v2361_v52, -inf }
 0x1f6   : > { %1028 = vmax.xlane.f32.xlu0 %v1027_v55  ;;  %1025 = vmax.xlane.f32.xlu2 %v1024_v56  ;;  %v1030_v57 = vsel %vm599_vm2, %v2364_v54, -inf }
 0x1f7   : > { %1031 = vmax.xlane.f32.xlu1 %v1030_v57 }
 0x20a   : > { %1745 = vrot.lane.b32.xlu0 %v1744_v58, %s2041_s12 }
 0x210   : > { %1750 = vrot.lane.b32.xlu1 %v1749_v59, %s2041_s12 }
 0x261   : > { %v1023_v17 = vpop.xlane.xlu2 %1022 }
 0x262   : > { %v2388_v30 = vmax.f32 %v2385_v15, %v1023_v17 }
 0x264   : > { %v1037_v40 = vsub.f32 %v2385_v15, %v2388_v30  ;;  %1238 = vst.msk [vmem:[#allocation3] sm:$0xff] %vm604_vm4, %v2388_v30  ;;  %1051 = vperm.xlu1 %1756, %v2388_v30   ;;  %v1081_v15 = vld [vmem:[#allocation4] sm:$0xff] }
 0x269   : > { %v1029_v1 = vpop.xlane.xlu0 %1028  ;;  %v1026_v2 = vpop.xlane.xlu2 %1025 }
 0x26a   : > { %v2402_v3 = vmax.f32 %v2395_v62, %v1029_v1  ;;  %v2405_v4 = vmax.f32 %v2397_v63, %v1026_v2  ;;  %v1032_v5 = vpop.xlane.xlu1 %1031 }
 0x26b   : > { %v2408_v6 = vmax.f32 %v2399_v0, %v1032_v5 }
 0x26c   : > { %v1039_v7 = vsub.f32 %v2395_v62, %v2402_v3  ;;  %1240 = vst.msk [vmem:[#allocation3 + $0x10] sm:$0xff] %vm604_vm4, %v2402_v3  ;;  %v1038_v8 = vsub.f32 %v2397_v63, %v2405_v4  ;;  %1061 = vperm.xlu2 %1754, %v2402_v3   ;;  %v1083_v3 = vld [vmem:[#allocation4 + $0x10] sm:$0xff]  ;;  %v1082_v63 = vld [vmem:[#allocation4 + $0x8] sm:$0xff] }
 0x26d   : > { %1239 = vst.msk [vmem:[#allocation3 + $0x8] sm:$0xff] %vm604_vm4, %v2405_v4  ;;  %v1040_v9 = vsub.f32 %v2399_v0, %v2408_v6  ;;  %1066 = vperm.xlu0 %1755, %v2408_v6  }
 0x26e   : > { %1241 = vst.msk [vmem:[#allocation3 + $0x18] sm:$0xff] %vm604_vm4, %v2408_v6  ;;  %v1041_v6 = vmul.f32 1.442695, %v1037_v40 }
 0x274   : > { %1056 = vperm.xlu2 %1754, %v2405_v4  }
 0x27c   : > { %v1746_v10 = vpop.permute.xlu0 %1745 }
 0x27d   : > { %v1748_v11 = vunpack.i.h.bf16 %v1746_v10  ;;  %v1747_v12 = vunpack.i.l.bf16 %v1746_v10 }
 0x27f   : > { %v802_v14 = vrot.slane %v1748_v11, 4  ;;  %v790_v16 = vrot.slane %v1747_v12, 4 }
 0x282   : > { %v1751_v13 = vpop.permute.xlu1 %1750 }
 0x283   : > { %v1753_v18 = vunpack.i.h.bf16 %v1751_v13  ;;  %v1752_v19 = vunpack.i.l.bf16 %v1751_v13 }
 0x285   : > { %v800_v20 = vrot.slane %v1753_v18, 4  ;;  %v788_v21 = vrot.slane %v1752_v19, 4  ;;  %v791_v22 = vsel %vm489_vm1, %v1752_v19, %v790_v16  ;;  %v803_v23 = vsel %vm489_vm1, %v1753_v18, %v802_v14 }
 0x286   : > { %v799_v25 = vperm.slane %v791_v22, %v2247_v24  ;;  %v811_v26 = vperm.slane %v803_v23, %v2247_v24 }
 0x287   : > { %v789_v27 = vsel %vm489_vm1, %v788_v21, %v1747_v12  ;;  %v801_v28 = vsel %vm489_vm1, %v800_v20, %v1748_v11 }
 0x288   : > { %v795_v29 = vperm.slane %v789_v27, %v2247_v24  ;;  %v807_v31 = vperm.slane %v801_v28, %v2247_v24  ;;  %v824_v32 = vrot.slane %v811_v26, 4  ;;  %v826_v33 = vrot.slane %v799_v25, 4 }
 0x28a   : > { %v812_v34 = vrot.slane %v807_v31, 4  ;;  %v814_v35 = vrot.slane %v795_v29, 4  ;;  %v825_v36 = vsel %vm489_vm1, %v824_v32, %v799_v25  ;;  %v827_v37 = vsel %vm489_vm1, %v811_v26, %v826_v33 }
 0x28b   : > { %v831_v38 = vperm.slane %v825_v36, %v2262_v39  ;;  %v835_v41 = vperm.slane %v827_v37, %v2262_v39 }
 0x28c   : > { %v813_v42 = vsel %vm489_vm1, %v812_v34, %v795_v29  ;;  %v815_v43 = vsel %vm489_vm1, %v807_v31, %v814_v35 }
 0x28d   : > { %v819_v44 = vperm.slane %v813_v42, %v2262_v39  ;;  %v823_v45 = vperm.slane %v815_v43, %v2262_v39  ;;  %v840_v46 = vrot.slane %v831_v38, 4  ;;  %v842_v48 = vrot.slane %v835_v41, 4 }
 0x28f   : > { %v836_v49 = vrot.slane %v819_v44, 4  ;;  %v838_v51 = vrot.slane %v823_v45, 4  ;;  %v843_v53 = vsel %vm489_vm1, 0.0, %v842_v48  ;;  %v855_v55 = vsel %vm489_vm1, %v842_v48, %v831_v38 }
 0x290   : > { %v860_v56 = vrot.slane %v843_v53, 4  ;;  %v841_v58 = vsel %vm489_vm1, 0.0, %v840_v46  ;;  %v859_v60 = vperm.slane %v855_v55, %v2247_v24 }
 0x291   : > { %v839_v57 = vsel %vm489_vm1, 0.0, %v838_v51  ;;  %v844_v59 = vsel %vm489_vm1, %v838_v51, %v819_v44  ;;  %v837_v2 = vsel %vm489_vm1, 0.0, %v836_v49 }
 0x292   : > { %v849_v61 = vrot.slane %v839_v57, 4  ;;  %v848_v17 = vperm.slane %v844_v59, %v2247_v24  ;;  %v861_v1 = vsel %vm489_vm1, %v860_v56, %v841_v58  ;;  %v880_v10 = vrot.slane %v859_v60, 4 }
 0x293   : > { %v865_v5 = vperm.slane %v861_v1, %v2247_v24 }
 0x294   : > { %v850_v11 = vsel %vm489_vm1, %v849_v61, %v837_v2  ;;  %v868_v12 = vrot.slane %v848_v17, 4  ;;  %v1043_v61 = vmul.f32 1.442695, %v1038_v8 }
 0x295   : > { %v854_v13 = vperm.slane %v850_v11, %v2247_v24  ;;  %v881_v14 = vsel %vm489_vm1, %v865_v5, %v880_v10  ;;  %v878_v16 = vrot.slane %v865_v5, 4 }
 0x296   : > { %v889_v18 = vperm.slane %v881_v14, %v2262_v39 }
 0x297   : > { %v869_v19 = vsel %vm489_vm1, %v854_v13, %v868_v12  ;;  %v866_v20 = vrot.slane %v854_v13, 4  ;;  %v879_v21 = vsel %vm489_vm1, %v878_v16, %v859_v60  ;;  %v1084_v13 = vld [vmem:[#allocation4 + $0x18] sm:$0xff] }
 0x298   : > { %v877_v22 = vperm.slane %v869_v19, %v2262_v39  ;;  %v894_v23 = vrot.slane %v889_v18, 4  ;;  %v885_v25 = vperm.slane %v879_v21, %v2262_v39  ;;  %v1110_v21 = vld [vmem:[#allocation5] sm:$0xff] }
 0x299   : > { %v867_v26 = vsel %vm489_vm1, %v866_v20, %v848_v17 }
 0x29a   : > { %v895_v27 = vsel %vm489_vm1, %v894_v23, %v877_v22  ;;  %v873_v28 = vperm.slane %v867_v26, %v2262_v39  ;;  %v890_v29 = vrot.slane %v885_v25, 4  ;;  %v896_v31 = vrot.slane %v877_v22, 4 }
 0x29b   : > { %1202 = vmatpush.msra.mxu2 %v895_v27 }
 0x29c   : > { %v891_v32 = vsel %vm489_vm1, %v890_v29, %v873_v28  ;;  %v897_v33 = vsel %vm489_vm1, %v889_v18, %v896_v31  ;;  %v892_v34 = vrot.slane %v873_v28, 4  ;;  %v1113_v31 = vld [vmem:[#allocation5 + $0x18] sm:$0xff] }
 0x29d   : > { %1156 = vmatpush.msrb.mxu0 %v891_v32  ;;  %1225 = vmatpush.msra.mxu3 %v897_v33 }
 0x29e   : > { %v893_v35 = vsel %vm489_vm1, %v885_v25, %v892_v34  ;;  %v1112_v25 = vld [vmem:[#allocation5 + $0x10] sm:$0xff] }
 0x29f   : > { %1179 = vmatpush.msrb.mxu1 %v893_v35 }
 0x2c6   : > { %v1062_v36 = vpop.permute.xlu2 %1061 }
 0x2c7   : > { %v1071_v37 = vsub.f32 %v2361_v52, %v1062_v36 }
 0x2c9   : > { %v1077_v38 = vmul.f32 1.442695, %v1071_v37 }
 0x2cb   : > { %1760 = vpow2.f32 %v1077_v38 }
 0x2ce   : > { %v1057_v41 = vpop.permute.xlu2 %1056 }
 0x2cf   : > { %v1070_v42 = vsub.f32 %v2357_v50, %v1057_v41 }
 0x2d1   : > { %v1761_v43 = vpop.eup %1760  ;;  %v1075_v44 = vmul.f32 1.442695, %v1070_v42  ;;  %v1111_v42 = vld [vmem:[#allocation5 + $0x8] sm:$0xff] }
 0x2d2   : > { %1625 = vmatmul.msk.f32.vlgmr.msra.gmra.mxu2 %vm599_vm2, %v1761_v43  ;;  %v1095_v45 = vsel %vm599_vm2, %v1761_v43, 0.0 }
 0x2d3   : > { %1762 = vpow2.f32 %v1075_v44  ;;  %1096 = vadd.xlane.f32.xlu1 %v1095_v45 }
 0x2d6   : > { %v1052_v46 = vpop.permute.xlu1 %1051 }
 0x2d7   : > { %v1069_v48 = vsub.f32 %v2353_v47, %v1052_v46  ;;  %v1047_v47 = vmul.f32 1.442695, %v1040_v9 }
 0x2d9   : > { %v1763_v49 = vpop.eup %1762  ;;  %v1073_v51 = vmul.f32 1.442695, %v1069_v48 }
 0x2da   : > { %1624 = vmatmul.msk.f32.vlgmr.msrb.gmra.mxu1 %vm599_vm2, %v1763_v49  ;;  %v1092_v52 = vsel %vm599_vm2, %v1763_v49, 0.0 }
 0x2db   : > { %1764 = vpow2.f32 %v1073_v51  ;;  %1093 = vadd.xlane.f32.xlu1 %v1092_v52 }
 0x2df   : > { %v1067_v50 = vpop.permute.xlu0 %1066 }
 0x2e0   : > { %v1072_v53 = vsub.f32 %v2364_v54, %v1067_v50  ;;  %v1045_v54 = vmul.f32 1.442695, %v1039_v7 }
 0x2e1   : > { %v1765_v55 = vpop.eup %1764 }
 0x2e2   : > { %v1079_v56 = vmul.f32 1.442695, %v1072_v53  ;;  %1623 = vmatmul.msk.f32.vlgmr.msrb.gmra.mxu0 %vm599_vm2, %v1765_v55  ;;  %v1089_v57 = vsel %vm599_vm2, %v1765_v55, 0.0 }
 0x2e3   : > { %1090 = vadd.xlane.f32.xlu0 %v1089_v57 }
 0x2e4   : > { %1766 = vpow2.f32 %v1079_v56 }
 0x2e5   : > { %1768 = vpow2.f32 %v1047_v47 }
 0x2e6   : > { %1770 = vpow2.f32 %v1045_v54 }
 0x2e7   : > { %1772 = vpow2.f32 %v1043_v61 }
 0x2e8   : > { %1774 = vpow2.f32 %v1041_v6 }
 0x2ea   : > { %v1767_v58 = vpop.eup %1766 }
 0x2eb   : > { %1626 = vmatmul.msk.f32.vlgmr.msra.gmra.mxu3 %vm599_vm2, %v1767_v58  ;;  %v1098_v59 = vsel %vm599_vm2, %v1767_v58, 0.0  ;;  %v1769_v60 = vpop.eup %1768 }
 0x2ec   : > { %1099 = vadd.xlane.f32.xlu2 %v1098_v59  ;;  %v1771_v0 = vpop.eup %1770  ;;  %v1088_v14 = vmul.f32 %v1769_v60, %v1084_v13 }
 0x2ed   : > { %v1773_v9 = vpop.eup %1772  ;;  %v1087_v7 = vmul.f32 %v1771_v0, %v1083_v3 }
 0x2ee   : > { %v1775_v62 = vpop.eup %1774  ;;  %v1086_v4 = vmul.f32 %v1773_v9, %v1082_v63 }
 0x2ef   : > { %v1085_v30 = vmul.f32 %v1775_v62, %v1081_v15 }
 0x2f4   : > { %1131 = vperm.xlu1 %1756, %v1769_v60  }
 0x2f7   : > { %1126 = vperm.xlu0 %1755, %v1771_v0  }
 0x2ff   : > { %1121 = vperm.xlu0 %1755, %v1773_v9  }
 0x304   : > { %1116 = vperm.xlu2 %1754, %v1775_v62  }
 0x346   : > { %v1097_v17 = vpop.xlane.xlu1 %1096 }
 0x347   : > { %v1103_v1 = vadd.f32 %v1097_v17, %v1087_v7 }
 0x349   : > { %1108 = vst.msk [vmem:[#allocation4 + $0x10] sm:$0xff] %vm604_vm4, %v1103_v1 }
 0x34e   : > { %v1094_v8 = vpop.xlane.xlu1 %1093 }
 0x34f   : > { %v1102_v2 = vadd.f32 %v1094_v8, %v1086_v4 }
 0x350   : > { %v1247_v5 = vld [vmem:[#allocation4 + $0x10] sm:$0xff] }
 0x351   : > { %1107 = vst.msk [vmem:[#allocation4 + $0x8] sm:$0xff] %vm604_vm4, %v1102_v2  ;;  %1776 = vrcp.f32 %v1247_v5 }
 0x355   : > { %v1204_v35 = vpop.f32.mrf.mxu2 }
 0x356   : > { %v1091_v40 = vpop.xlane.xlu0 %1090 }
 0x357   : > { %v1777_v10 = vpop.eup %1776  ;;  %v1101_v11 = vadd.f32 %v1091_v40, %v1085_v30  ;;  %v1181_v46 = vpop.f32.mrf.mxu1 }
 0x358   : > { %1269 = vperm.xlu2 %1754, %v1777_v10   ;;  %v1246_v12 = vld [vmem:[#allocation4 + $0x8] sm:$0xff] }
 0x359   : > { %1106 = vst.msk [vmem:[#allocation4] sm:$0xff] %vm604_vm4, %v1101_v11  ;;  %1778 = vrcp.f32 %v1246_v12 }
 0x35f   : > { %v1779_v16 = vpop.eup %1778  ;;  %v1100_v18 = vpop.xlane.xlu2 %1099 }
 0x360   : > { %1264 = vperm.xlu2 %1754, %v1779_v16   ;;  %v1104_v19 = vadd.f32 %v1100_v18, %v1088_v14  ;;  %v1245_v20 = vld [vmem:[#allocation4] sm:$0xff]  ;;  %v1158_v27 = vpop.f32.mrf.mxu0 }
 0x361   : > { %1780 = vrcp.f32 %v1245_v20 }
 0x362   : > { %1109 = vst.msk [vmem:[#allocation4 + $0x18] sm:$0xff] %vm604_vm4, %v1104_v19 }
 0x366   : > { %v1132_v32 = vpop.permute.xlu1 %1131 }
 0x367   : > { %v1781_v22 = vpop.eup %1780  ;;  %v1117_v23 = vpop.permute.xlu2 %1116  ;;  %v1137_v37 = vmul.f32 %v1132_v32, %v1113_v31 }
 0x368   : > { %1259 = vperm.xlu0 %1755, %v1781_v22   ;;  %v1134_v26 = vmul.f32 %v1117_v23, %v1110_v21 }
 0x369   : > { %v1127_v28 = vpop.permute.xlu0 %1126  ;;  %v1248_v29 = vld [vmem:[#allocation4 + $0x18] sm:$0xff] }
 0x36a   : > { %v1230_v33 = vadd.f32 %v1158_v27, %v1134_v26  ;;  %v1136_v34 = vmul.f32 %v1127_v28, %v1112_v25  ;;  %1782 = vrcp.f32 %v1248_v29 }
 0x36c   : > { %1234 = vst.msk [vmem:[#allocation5] sm:$0xff] %vm599_vm2, %v1230_v33  ;;  %v1232_v36 = vadd.f32 %v1204_v35, %v1136_v34 }
 0x36e   : > { %1236 = vst.msk [vmem:[#allocation5 + $0x10] sm:$0xff] %vm599_vm2, %v1232_v36  ;;  %v1227_v38 = vpop.f32.mrf.mxu3 }
 0x36f   : > { %v1233_v41 = vadd.f32 %v1227_v38, %v1137_v37 }
 0x370   : > { %v1783_v43 = vpop.eup %1782 }
 0x371   : > { %1237 = vst.msk [vmem:[#allocation5 + $0x18] sm:$0xff] %vm599_vm2, %v1233_v41  ;;  %v1122_v44 = vpop.permute.xlu0 %1121  ;;  %1274 = vperm.xlu1 %1756, %v1783_v43  }
 0x372   : > { %v1135_v45 = vmul.f32 %v1122_v44, %v1111_v42 }
 0x373   : > { %v1253_v52 = vld [vmem:[#allocation5] sm:$0xff] }
 0x374   : > { %v1231_v48 = vadd.f32 %v1181_v46, %v1135_v45 }
 0x375   : > { %v1255_v50 = vld [vmem:[#allocation5 + $0x10] sm:$0xff] }
 0x376   : > { %1235 = vst.msk [vmem:[#allocation5 + $0x8] sm:$0xff] %vm599_vm2, %v1231_v48 }
 0x378   : > { %v1256_v0 = vld [vmem:[#allocation5 + $0x18] sm:$0xff] }
 0x37d   : > { %v1254_v47 = vld [vmem:[#allocation5 + $0x8] sm:$0xff] }
 0x3b2   : > { %v1270_v49 = vpop.permute.xlu2 %1269 }
 0x3b3   : > { %v1279_v55 = vmul.f32 %v1270_v49, %v1255_v50 }
 0x3b5   : > { %v1281_v58 = vrot.slane %v1279_v55, 4 }
 0x3ba   : > { %v1265_v56 = vpop.permute.xlu2 %1264 }
 0x3bb   : > { %v1278_v59 = vmul.f32 %v1265_v56, %v1254_v47 }
 0x3bd   : > { %v1296_v9 = vrot.slane %v1278_v59, 4 }
 0x3da   : > { %v1260_v51 = vpop.permute.xlu0 %1259 }
 0x3db   : > { %v1277_v53 = vmul.f32 %v1260_v51, %v1253_v52 }
 0x3dd   : > { %v1284_v57 = vrot.slane %v1277_v53, 4  ;;  %v1283_v60 = vsel %vm489_vm1, %v1281_v58, %v1277_v53 }
 0x3de   : > { %v1289_v3 = vperm.slane %v1283_v60, %v2247_v24  ;;  %v1411_v60 = vld [vmem:[#allocation14 + $0x8] sm:$0xff] }
 0x3df   : > { %v1285_v54 = vsel %vm489_vm1, %v1279_v55, %v1284_v57 }
 0x3e0   : > { %v1293_v61 = vperm.slane %v1285_v54, %v2247_v24  ;;  %v1308_v8 = vrot.slane %v1289_v3, 4  ;;  %v1413_v54 = vld [vmem:[#allocation14 + $0x18] sm:$0xff] }
 0x3e1   : > { %1434 = vmatpush.msra.mxu0 %v1413_v54 }
 0x3e2   : > { %v1320_v1 = vrot.slane %v1293_v61, 4 }
 0x3e3   : > { %v1275_v6 = vpop.permute.xlu1 %1274 }
 0x3e4   : > { %v1280_v62 = vmul.f32 %v1275_v6, %v1256_v0 }
 0x3e6   : > { %v1294_v7 = vrot.slane %v1280_v62, 4  ;;  %v1297_v17 = vsel %vm489_vm1, %v1280_v62, %v1296_v9 }
 0x3e7   : > { %v1305_v63 = vperm.slane %v1297_v17, %v2247_v24  ;;  %v1759_v17 = vld [vmem:[%s2589_s7] ss:$0 sm:$0xff] }
 0x3e8   : > { %v1295_v4 = vsel %vm489_vm1, %v1294_v7, %v1278_v59 }
 0x3e9   : > { %v1301_v2 = vperm.slane %v1295_v4, %v2247_v24  ;;  %v1318_v5 = vrot.slane %v1305_v63, 4  ;;  %v1321_v15 = vsel %vm489_vm1, %v1305_v63, %v1320_v1 }
 0x3ea   : > { %v1329_v30 = vperm.slane %v1321_v15, %v2262_v39 }
 0x3eb   : > { %v1306_v40 = vrot.slane %v1301_v2, 4  ;;  %v1309_v10 = vsel %vm489_vm1, %v1301_v2, %v1308_v8  ;;  %v1319_v11 = vsel %vm489_vm1, %v1318_v5, %v1293_v61  ;;  %v1410_v61 = vld [vmem:[#allocation14] sm:$0xff] }
 0x3ec   : > { %v1317_v12 = vperm.slane %v1309_v10, %v2262_v39  ;;  %v1325_v13 = vperm.slane %v1319_v11, %v2262_v39  ;;  %v1336_v14 = vrot.slane %v1329_v30, 4 }
 0x3ed   : > { %v1307_v16 = vsel %vm489_vm1, %v1306_v40, %v1289_v3 }
 0x3ee   : > { %v1313_v18 = vperm.slane %v1307_v16, %v2262_v39  ;;  %v1332_v19 = vrot.slane %v1317_v12, 4  ;;  %v1334_v20 = vrot.slane %v1325_v13, 4  ;;  %v1337_v21 = vsel %vm489_vm1, 0.0, %v1336_v14 }
 0x3ef   : > { %v1349_v22 = vsel %vm489_vm1, %v1336_v14, %v1325_v13  ;;  %v1354_v23 = vrot.slane %v1337_v21, 4 }
 0x3f0   : > { %v1333_v25 = vsel %vm489_vm1, 0.0, %v1332_v19  ;;  %v1330_v26 = vrot.slane %v1313_v18, 4  ;;  %v1335_v27 = vsel %vm489_vm1, 0.0, %v1334_v20  ;;  %v1338_v28 = vsel %vm489_vm1, %v1332_v19, %v1313_v18 }
 0x3f1   : > { %v1343_v29 = vrot.slane %v1333_v25, 4  ;;  %v1342_v31 = vperm.slane %v1338_v28, %v2247_v24  ;;  %v1353_v32 = vperm.slane %v1349_v22, %v2247_v24  ;;  %v1355_v33 = vsel %vm489_vm1, %v1354_v23, %v1335_v27 }
 0x3f2   : > { %v1331_v34 = vsel %vm489_vm1, 0.0, %v1330_v26  ;;  %v1359_v35 = vperm.slane %v1355_v33, %v2247_v24 }
 0x3f3   : > { %v1344_v36 = vsel %vm489_vm1, %v1343_v29, %v1331_v34  ;;  %v1362_v37 = vrot.slane %v1342_v31, 4  ;;  %v1374_v38 = vrot.slane %v1353_v32, 4 }
 0x3f4   : > { %v1348_v41 = vperm.slane %v1344_v36, %v2247_v24  ;;  %v1372_v42 = vrot.slane %v1359_v35, 4 }
 0x3f5   : > { %v1375_v43 = vsel %vm489_vm1, %v1359_v35, %v1374_v38 }
 0x3f6   : > { %v1363_v44 = vsel %vm489_vm1, %v1348_v41, %v1362_v37  ;;  %v1383_v45 = vperm.slane %v1375_v43, %v2262_v39  ;;  %v1360_v46 = vrot.slane %v1348_v41, 4  ;;  %v1373_v48 = vsel %vm489_vm1, %v1372_v42, %v1353_v32 }
 0x3f7   : > { %v1371_v49 = vperm.slane %v1363_v44, %v2262_v39  ;;  %v1379_v51 = vperm.slane %v1373_v48, %v2262_v39 }
 0x3f8   : > { %v1388_v52 = vrot.slane %v1383_v45, 4  ;;  %v1361_v50 = vsel %vm489_vm1, %v1360_v46, %v1342_v31 }
 0x3f9   : > { %v1390_v53 = vrot.slane %v1371_v49, 4  ;;  %v1367_v24 = vperm.slane %v1361_v50, %v2262_v39  ;;  %v1384_v55 = vrot.slane %v1379_v51, 4  ;;  %v1412_v39 = vld [vmem:[#allocation14 + $0x10] sm:$0xff] }
 0x3fa   : > { %v1389_v56 = vsel %vm489_vm1, %v1388_v52, %v1371_v49  ;;  %1435 = vmatpush.msra.mxu0 %v1412_v39 }
 0x3fb   : > { %1397 = vrot.lane.b32.xlu1 %v1389_v56, %s2044_s13  ;;  %v1391_v57 = vsel %vm489_vm1, %v1383_v45, %v1390_v53  ;;  %v1386_v47 = vrot.slane %v1367_v24, 4  ;;  %v1385_v58 = vsel %vm489_vm1, %v1384_v55, %v1367_v24 }
 0x3fc   : > { %1401 = vrot.lane.b32.xlu2 %v1391_v57, %s2045_s19  ;;  %1436 = vmatpush.msra.mxu0 %v1411_v60 }
 0x3fd   : > { %v1387_v59 = vsel %vm489_vm1, %v1379_v51, %v1386_v47 }
 0x3fe   : > { %1393 = vrot.lane.b32.xlu0 %v1387_v59, %s2046_s22  ;;  %1437 = vmatpush.msra.mxu0 %v1410_v61 }
 0x456   : > { %v1402_v62 = vpop.permute.xlu2 %1401 }
 0x46d   : > { %v1398_v6 = vpop.permute.xlu1 %1397 }
 0x470   : > { %v1394_v0 = vpop.permute.xlu0 %1393 }
 0x471   : > { %v1405_v9 = vsel %vm599_vm2, %v1385_v58, %v1394_v0 }
 0x472   : > { %v1407_v3 = vsel %vm1406_vm5, %v1405_v9, %v1398_v6 }
 0x473   : > { %v1409_v7 = vsel %vm1408_vm6, %v1407_v3, %v1402_v62 }
 0x474   : > { %1627 = vmatmul.msk.f32.vlgmr.msra.gmra.mxu0 %vm453_vm0, %v1409_v7 }
 0x4f1   : > { %v1439_v1 = vpop.f32.mrf.mxu0 }
 0x4f2   : > { %v1440_v63 = vadd.f32 %v1759_v17, %v1439_v1 }
 0x4f4   : > { %1442 = vst.msk [vmem:[%s437_s29] sm:$0xff] %vm453_vm0, %v1440_v63 }
 0x4f5   : > { %1961 = shalt.err (!%p1958_p13)
}
 0x4f6   : > { %1648 = dma.vmem_to_hbm [thread:$0]  (%p2179_p4), %s1458_s9, 128, %s1460_s11, %s1444_s15  }
 0x4f7 PF: > { %s2614_s21 = sld [smem:[#allocation21_spill]]  ;;  %p1668_p0 = pnand %p1601_p6, %p2187_p7 }
 0x4f9   : > { %p1669_p2 = pneg %p1668_p0 }
 0x4fd   : > { %s1471_s13 = sand.u32 1, %s2614_s21  }
 0x4fe   : > { %s1472_s19 = scalar_lea.sflag [#allocation8], %s1471_s13 }
 0x4ff   : > { %2003 = dma.done.wait (%p1669_p2), %s1472_s19, 128  }
 0x500   : > { %2005 = vsyncadd (%p1669_p2), %s1472_s19, 4294967168  ;;  %s28_s10 = sadd.s32 1, %s2028_s10   ;;  %s2616_s22 = sld [smem:[#allocation22_spill]] }
 0x501   : > { %p25_p5 = scmp.ge.s32.totalorder %s28_s10, 4   ;;  %s2617_s29 = sld [smem:[#allocation25_spill]] }
 0x502   : > { %s2618_s30 = sld [smem:[#allocation23_spill]]  ;;  %s2620_s27 = smov %s2012_s28 }
 0x503   : > { %s2619_s9 = sld [smem:[#allocation24_spill]]  ;;  %27 = sbr.rel (!%p25_p5) target bundleno = 13 (0xd), region = 134 }
 0x506   : > { %s2621_s28 = smov %s2616_s22 }
 0x508   :  { %1478 = vsyncpa [#allocation7], 1 }
 0x509   :  { %1480 = vsyncpa [#allocation7 + $0x1], 1 }
 0x50a   :  { %1481 = vsyncpa [#allocation10], 1 }
 0x50b   :  { %1483 = vsyncpa [#allocation10 + $0x1], 1 }
 0x50c   :  { %1484 = vsyncpa [#allocation13], 1 }
 0x50d   :  { %1485 = vsyncpa [#allocation8], 1 }
 0x50e   :  { %1487 = vsyncpa [#allocation8 + $0x1], 1 }

</bundles_post_ra>
